<compile_context>
chip_gen: v7x
topology: tpu7x:2x2x1
jax: 0.10.0
libtpu: 0.0.40
codegen_flags: <defaults>
</compile_context>

<pallas_src>
import jax
import jax.numpy as jnp
from jax.experimental import pallas as pl
from jax.experimental.pallas import tpu as pltpu


def _round_up(x, m):
    return (x + m - 1) // m * m


def _vmem_capacity_bytes():
    """Physical VMEM per TensorCore, with conservative fallbacks."""
    try:
        return int(pltpu.get_tpu_info().vmem_capacity_bytes)
    except Exception:
        pass
    try:
        kind = jax.devices()[0].device_kind.lower()
        if "v7" in kind:
            return 64 << 20
        return 128 << 20           # v5e / v6e
    except Exception:
        return 64 << 20            # conservative default


def _column_chunks(H):
    """Static column chunks of w_dense.

    256-wide chunks match the 2x256^2 MXU (v6e/v7x) and bound the live f32
    intermediate to [TM, 256] so it never round-trips VMEM as a full [TM, H]
    slab through the single vst slot.
    """
    if H % 256 == 0:
        cw = 256
    elif H % 128 == 0:
        cw = 128
    else:
        # Small / ragged hidden sizes: single chunk. (If the real model's H is
        # not a multiple of 128, pad H in the param-prep step for dense lanes.)
        cw = H
    return [(c0, cw) for c0 in range(0, H, cw)]


def _make_head_kernel(H, L, L_pad):
    chunks = _column_chunks(H)

    def kernel(x_ref, w1_ref, b1_ref, w2_ref, b2_ref, o_ref):
        # x tile arrives as f32 [TM, H]; cast to bf16 here (no extra HBM pass).
        xb = x_ref[...].astype(jnp.bfloat16)
        tm = x_ref.shape[0]
        acc = jnp.zeros((tm, L_pad), dtype=jnp.float32)
        # Fused dense -> +bias -> tanh -> out_proj accumulate, one static
        # column chunk of w_dense at a time (EUP tanh overlaps MXU work).
        for c0, cw in chunks:
            h = jnp.dot(xb, w1_ref[:, c0:c0 + cw],
                        preferred_element_type=jnp.float32)
            h = jnp.tanh(h + b1_ref[:, c0:c0 + cw])
            acc = acc + jnp.dot(h.astype(jnp.bfloat16), w2_ref[c0:c0 + cw, :],
                                preferred_element_type=jnp.float32)
        out = acc + b2_ref[...]
        # Only the real num_labels columns are written back to HBM.
        o_ref[...] = out[:, :L].astype(o_ref.dtype)

    return kernel


def prepare_head_params(w_dense, b_dense, w_out, b_out):
    """One-time weight prep (cast + lane-pad). Hoisted out of the per-call path
    so the O(H^2) re-cast of static weights is not paid on every forward."""
    H = w_dense.shape[0]
    L = w_out.shape[1]
    L_pad = _round_up(max(L, 128), 128)
    w1 = w_dense.astype(jnp.bfloat16)                               # [H, H]
    b1 = jnp.asarray(b_dense, jnp.float32).reshape(1, H)            # [1, H]
    w2p = jnp.zeros((H, L_pad), dtype=jnp.bfloat16).at[:, :L].set(
        w_out.astype(jnp.bfloat16))                                 # [H, L_pad]
    b2p = jnp.zeros((1, L_pad), dtype=jnp.float32).at[:, :L].set(
        jnp.asarray(b_out, jnp.float32).reshape(1, L))              # [1, L_pad]
    return w1, b1, w2p, b2p, L, L_pad


def model_head_forward(features, params):
    """features: [..., H] -> [..., num_labels] (same math as ModelHead.forward,
    eval mode)."""
    w1, b1, w2p, b2p, L, L_pad = params
    orig_shape = features.shape
    H = orig_shape[-1]
    out_dtype = features.dtype

    x2d = features.reshape(-1, H)   # cheap view-reshape; x streams in as f32
    M = x2d.shape[0]

    vmem_cap = _vmem_capacity_bytes()

    # --- M tiling: 1024 on 128 MiB chips (v5e/v6e), 512 on 64 MiB v7x; for
    #     small M, split into >=2 tiles so both v7x TensorCores get work. -----
    TM = 1024 if vmem_cap >= (100 << 20) else 512
    if M <= TM:
        if M > 64:
            TM = _round_up((M + 1) // 2, 16)
        else:
            TM = _round_up(M, 8)
    grid_m = pl.cdiv(M, TM)

    # --- VMEM budget (weights counted double-buffered as safety headroom) ----
    vmem_bytes = (
        2 * TM * H * 4                  # x tiles (f32, double-buffered)
        + 2 * TM * L * 4                # out tiles
        + 2 * (H * H + H * L_pad) * 2   # weights (bf16)
        + (H + L_pad) * 4               # biases (f32)
        + TM * H * 2                    # in-kernel bf16 copy of x
        + TM * L_pad * 4                # f32 accumulator
        + TM * 256 * 8                  # per-chunk h (f32 + bf16 cast)
    )
    vmem_limit = int(min(vmem_bytes * 1.5 + (8 << 20), vmem_cap * 3 // 4))
    # TODO(synk): for very large H (>= ~4096) on v7x the resident weights no
    # longer fit ~48 MiB; that case needs a K/N-tiled weight pipeline instead
    # of full-weight residency.

    cost = pl.CostEstimate(
        flops=2 * M * H * H + 2 * M * H * L_pad,
        transcendentals=M * H,
        bytes_accessed=(M * H * 4 + (H * H + H * L_pad) * 2
                        + M * L * 4 + (H + L_pad) * 4),
    )

    kernel = _make_head_kernel(H, L, L_pad)

    def run(single_buffer_weights):
        if single_buffer_weights:
            def wspec(shape):
                return pl.BlockSpec(shape, lambda i: (0, 0),
                                    pipeline_mode=pl.Buffered(1))
        else:
            def wspec(shape):
                return pl.BlockSpec(shape, lambda i: (0, 0))
        return pl.pallas_call(
            kernel,
            out_shape=jax.ShapeDtypeStruct((M, L), out_dtype),
            grid_spec=pltpu.PrefetchScalarGridSpec(
                num_scalar_prefetch=0,
                grid=(grid_m,),
                in_specs=[
                    pl.BlockSpec((TM, H), lambda i: (i, 0)),  # x tile (pipelined)
                    wspec((H, H)),        # w_dense (VMEM-resident, 1 buffer)
                    wspec((1, H)),        # b_dense
                    wspec((H, L_pad)),    # w_out
                    wspec((1, L_pad)),    # b_out
                ],
                out_specs=pl.BlockSpec((TM, L), lambda i: (i, 0)),
            ),
            compiler_params=pltpu.CompilerParams(
                dimension_semantics=("parallel",),   # shard M tiles across TCs
                vmem_limit_bytes=vmem_limit,
            ),
            cost_estimate=cost,
        )(x2d, w1, b1, w2p, b2p)

    try:
        out = run(single_buffer_weights=True)
    except Exception:
        # pl.Buffered(1) unavailable / rejected on this JAX build: fall back to
        # default double-buffered weight specs (correctness identical).
        out = run(single_buffer_weights=False)

    return out.reshape(*orig_shape[:-1], L)


if __name__ == "__main__":
    # Small shapes consistent with the module: features [batch, seq, hidden].
    batch, seq, hidden, num_labels = 2, 8, 32, 4

    key = jax.random.PRNGKey(0)
    k_x, k_w1, k_b1, k_w2, k_b2 = jax.random.split(key, 5)

    features = jax.random.normal(k_x, (batch, seq, hidden), dtype=jnp.float32)

    # Synthetic params mirroring nn.Linear shapes, stored pre-transposed [in, out].
    w_dense = jax.random.normal(k_w1, (hidden, hidden), dtype=jnp.float32) * 0.02
    b_dense = jax.random.normal(k_b1, (hidden,), dtype=jnp.float32) * 0.02
    w_out = jax.random.normal(k_w2, (hidden, num_labels), dtype=jnp.float32) * 0.02
    b_out = jax.random.normal(k_b2, (num_labels,), dtype=jnp.float32) * 0.02

    params = prepare_head_params(w_dense, b_dense, w_out, b_out)  # one-time prep
    out = model_head_forward(features, params)
    out = jax.block_until_ready(out)

    # Pure-JAX reference (f32); tolerance loosened for the bf16 MXU operands.
    ref = jnp.tanh(features.reshape(-1, hidden) @ w_dense + b_dense) @ w_out + b_out
    ref = ref.reshape(batch, seq, num_labels)
    assert out.shape == (batch, seq, num_labels)
    assert jnp.allclose(out, ref, atol=2e-2, rtol=2e-2), float(
        jnp.max(jnp.abs(out - ref)))

    print("KERNEL_OK")
</pallas_src>

<mosaic_0001>
module attributes {stable_mosaic.version = 11 : i64} {
  func.func @kernel(%arg0: i32, %arg1: memref<16x32xf32, #tpu.memory_space<vmem>>, %arg2: memref<32x32xbf16, #tpu.memory_space<vmem>>, %arg3: memref<1x32xf32, #tpu.memory_space<vmem>>, %arg4: memref<32x128xbf16, #tpu.memory_space<vmem>>, %arg5: memref<1x128xf32, #tpu.memory_space<vmem>>, %arg6: memref<16x4xf32, #tpu.memory_space<vmem>>) attributes {dimension_semantics = [#tpu.dimension_semantics<parallel>], iteration_bounds = array<i64: 1>, scalar_prefetch = 0 : i64, scratch_operands = 0 : i64, tpu.core_type = #tpu.core_type<tc>, window_params = [{transform_indices = @transform_0, window_bounds = array<i64: 16, 32>}, {pipeline_mode = #tpu.pipeline_mode<synchronous>, transform_indices = @transform_1, window_bounds = array<i64: 32, 32>}, {pipeline_mode = #tpu.pipeline_mode<synchronous>, transform_indices = @transform_2, window_bounds = array<i64: 1, 32>}, {pipeline_mode = #tpu.pipeline_mode<synchronous>, transform_indices = @transform_3, window_bounds = array<i64: 32, 128>}, {pipeline_mode = #tpu.pipeline_mode<synchronous>, transform_indices = @transform_4, window_bounds = array<i64: 1, 128>}, {transform_indices = @transform_5, window_bounds = array<i64: 16, 4>}]} {
    %c0 = arith.constant 0 : index
    %c0_0 = arith.constant 0 : index
    %0 = vector.load %arg1[%c0, %c0_0] : memref<16x32xf32, #tpu.memory_space<vmem>>, vector<16x32xf32>
    %1 = arith.truncf %0 : vector<16x32xf32> to vector<16x32xbf16>
    %cst = arith.constant 0.000000e+00 : f32
    %2 = vector.broadcast %cst : f32 to vector<16x128xf32>
    %c0_1 = arith.constant 0 : index
    %c0_2 = arith.constant 0 : index
    %3 = vector.load %arg2[%c0_1, %c0_2] : memref<32x32xbf16, #tpu.memory_space<vmem>>, vector<32x32xbf16>
    %cst_3 = arith.constant dense<0.000000e+00> : vector<16x32xf32>
    %4 = tpu.matmul %1, %3, %cst_3 {dimension_numbers = #tpu.dot_dimension_numbers<[1], [0], [0], [1], [0, 0, 1, 1], [], []>} : vector<16x32xbf16>, vector<32x32xbf16>, vector<16x32xf32> -> vector<16x32xf32>
    %c0_4 = arith.constant 0 : index
    %c0_5 = arith.constant 0 : index
    %5 = vector.load %arg3[%c0_4, %c0_5] : memref<1x32xf32, #tpu.memory_space<vmem>>, vector<1x32xf32>
    %6 = vector.broadcast %5 : vector<1x32xf32> to vector<16x32xf32>
    %7 = arith.addf %4, %6 : vector<16x32xf32>
    %8 = math.tanh %7 : vector<16x32xf32>
    %9 = arith.truncf %8 : vector<16x32xf32> to vector<16x32xbf16>
    %c0_6 = arith.constant 0 : index
    %c0_7 = arith.constant 0 : index
    %10 = vector.load %arg4[%c0_6, %c0_7] : memref<32x128xbf16, #tpu.memory_space<vmem>>, vector<32x128xbf16>
    %cst_8 = arith.constant dense<0.000000e+00> : vector<16x128xf32>
    %11 = tpu.matmul %9, %10, %cst_8 {dimension_numbers = #tpu.dot_dimension_numbers<[1], [0], [0], [1], [0, 0, 1, 1], [], []>} : vector<16x32xbf16>, vector<32x128xbf16>, vector<16x128xf32> -> vector<16x128xf32>
    %12 = arith.addf %2, %11 : vector<16x128xf32>
    %c0_9 = arith.constant 0 : index
    %c0_10 = arith.constant 0 : index
    %13 = vector.load %arg5[%c0_9, %c0_10] : memref<1x128xf32, #tpu.memory_space<vmem>>, vector<1x128xf32>
    %14 = vector.broadcast %13 : vector<1x128xf32> to vector<16x128xf32>
    %15 = arith.addf %12, %14 : vector<16x128xf32>
    %16 = vector.extract_strided_slice %15 {offsets = [0, 0], sizes = [16, 4], strides = [1, 1]} : vector<16x128xf32> to vector<16x4xf32>
    %c0_11 = arith.constant 0 : index
    %c0_12 = arith.constant 0 : index
    %17 = vector.load %arg6[%c0_11, %c0_12] : memref<16x4xf32, #tpu.memory_space<vmem>>, vector<16x4xf32>
    tpu.vector_store %arg6[%c0_11, %c0_12], %16 {strides = array<i32>} : memref<16x4xf32, #tpu.memory_space<vmem>>, vector<16x4xf32>,
    return
  }
  func.func @transform_0(%arg0: i32) -> (i32, i32) {
    %c0_i32 = arith.constant 0 : i32
    %c0_i32_0 = arith.constant 0 : i32
    return %arg0, %c0_i32 : i32, i32
  }
  func.func @transform_1(%arg0: i32) -> (i32, i32) {
    %c0_i32 = arith.constant 0 : i32
    %c0_i32_0 = arith.constant 0 : i32
    %c0_i32_1 = arith.constant 0 : i32
    return %c0_i32, %c0_i32_0 : i32, i32
  }
  func.func @transform_2(%arg0: i32) -> (i32, i32) {
    %c0_i32 = arith.constant 0 : i32
    %c0_i32_0 = arith.constant 0 : i32
    %c0_i32_1 = arith.constant 0 : i32
    return %c0_i32, %c0_i32_0 : i32, i32
  }
  func.func @transform_3(%arg0: i32) -> (i32, i32) {
    %c0_i32 = arith.constant 0 : i32
    %c0_i32_0 = arith.constant 0 : i32
    %c0_i32_1 = arith.constant 0 : i32
    return %c0_i32, %c0_i32_0 : i32, i32
  }
  func.func @transform_4(%arg0: i32) -> (i32, i32) {
    %c0_i32 = arith.constant 0 : i32
    %c0_i32_0 = arith.constant 0 : i32
    %c0_i32_1 = arith.constant 0 : i32
    return %c0_i32, %c0_i32_0 : i32, i32
  }
  func.func @transform_5(%arg0: i32) -> (i32, i32) {
    %c0_i32 = arith.constant 0 : i32
    %c0_i32_0 = arith.constant 0 : i32
    return %arg0, %c0_i32 : i32, i32
  }
}

module attributes {stable_mosaic.version = 11 : i64} {
  func.func @kernel(%arg0: i32, %arg1: memref<16x32xf32, #tpu.memory_space<vmem>>, %arg2: memref<32x32xbf16, #tpu.memory_space<vmem>>, %arg3: memref<1x32xf32, #tpu.memory_space<vmem>>, %arg4: memref<32x128xbf16, #tpu.memory_space<vmem>>, %arg5: memref<1x128xf32, #tpu.memory_space<vmem>>, %arg6: memref<16x4xf32, #tpu.memory_space<vmem>>) attributes {dimension_semantics = [#tpu.dimension_semantics<parallel>], iteration_bounds = array<i64: 1>, scalar_prefetch = 0 : i64, scratch_operands = 0 : i64, tpu.core_type = #tpu.core_type<tc>, window_params = [{transform_indices = @transform_0, window_bounds = array<i64: 16, 32>}, {pipeline_mode = #tpu.pipeline_mode<synchronous>, transform_indices = @transform_1, window_bounds = array<i64: 32, 32>}, {pipeline_mode = #tpu.pipeline_mode<synchronous>, transform_indices = @transform_2, window_bounds = array<i64: 1, 32>}, {pipeline_mode = #tpu.pipeline_mode<synchronous>, transform_indices = @transform_3, window_bounds = array<i64: 32, 128>}, {pipeline_mode = #tpu.pipeline_mode<synchronous>, transform_indices = @transform_4, window_bounds = array<i64: 1, 128>}, {transform_indices = @transform_5, window_bounds = array<i64: 16, 4>}]} {
    %c0 = arith.constant 0 : index
    %c0_0 = arith.constant 0 : index
    %0 = vector.load %arg1[%c0, %c0_0] : memref<16x32xf32, #tpu.memory_space<vmem>>, vector<16x32xf32>
    %1 = arith.truncf %0 : vector<16x32xf32> to vector<16x32xbf16>
    %cst = arith.constant 0.000000e+00 : f32
    %2 = vector.broadcast %cst : f32 to vector<16x128xf32>
    %c0_1 = arith.constant 0 : index
    %c0_2 = arith.constant 0 : index
    %3 = vector.load %arg2[%c0_1, %c0_2] : memref<32x32xbf16, #tpu.memory_space<vmem>>, vector<32x32xbf16>
    %cst_3 = arith.constant dense<0.000000e+00> : vector<16x32xf32>
    %4 = tpu.matmul %1, %3, %cst_3 {dimension_numbers = #tpu.dot_dimension_numbers<[1], [0], [0], [1], [0, 0, 1, 1], [], []>} : vector<16x32xbf16>, vector<32x32xbf16>, vector<16x32xf32> -> vector<16x32xf32>
    %c0_4 = arith.constant 0 : index
    %c0_5 = arith.constant 0 : index
    %5 = vector.load %arg3[%c0_4, %c0_5] : memref<1x32xf32, #tpu.memory_space<vmem>>, vector<1x32xf32>
    %6 = vector.broadcast %5 : vector<1x32xf32> to vector<16x32xf32>
    %7 = arith.addf %4, %6 : vector<16x32xf32>
    %8 = math.tanh %7 : vector<16x32xf32>
    %9 = arith.truncf %8 : vector<16x32xf32> to vector<16x32xbf16>
    %c0_6 = arith.constant 0 : index
    %c0_7 = arith.constant 0 : index
    %10 = vector.load %arg4[%c0_6, %c0_7] : memref<32x128xbf16, #tpu.memory_space<vmem>>, vector<32x128xbf16>
    %cst_8 = arith.constant dense<0.000000e+00> : vector<16x128xf32>
    %11 = tpu.matmul %9, %10, %cst_8 {dimension_numbers = #tpu.dot_dimension_numbers<[1], [0], [0], [1], [0, 0, 1, 1], [], []>} : vector<16x32xbf16>, vector<32x128xbf16>, vector<16x128xf32> -> vector<16x128xf32>
    %12 = arith.addf %2, %11 : vector<16x128xf32>
    %c0_9 = arith.constant 0 : index
    %c0_10 = arith.constant 0 : index
    %13 = vector.load %arg5[%c0_9, %c0_10] : memref<1x128xf32, #tpu.memory_space<vmem>>, vector<1x128xf32>
    %14 = vector.broadcast %13 : vector<1x128xf32> to vector<16x128xf32>
    %15 = arith.addf %12, %14 : vector<16x128xf32>
    %16 = vector.extract_strided_slice %15 {offsets = [0, 0], sizes = [16, 4], strides = [1, 1]} : vector<16x128xf32> to vector<16x4xf32>
    %c0_11 = arith.constant 0 : index
    %c0_12 = arith.constant 0 : index
    %17 = vector.load %arg6[%c0_11, %c0_12] : memref<16x4xf32, #tpu.memory_space<vmem>>, vector<16x4xf32>
    tpu.vector_store %arg6[%c0_11, %c0_12], %16 {strides = array<i32>} : memref<16x4xf32, #tpu.memory_space<vmem>>, vector<16x4xf32>,
    return
  }
  func.func @transform_0(%arg0: i32) -> (i32, i32) {
    %c0_i32 = arith.constant 0 : i32
    %c0_i32_0 = arith.constant 0 : i32
    return %arg0, %c0_i32 : i32, i32
  }
  func.func @transform_1(%arg0: i32) -> (i32, i32) {
    %c0_i32 = arith.constant 0 : i32
    %c0_i32_0 = arith.constant 0 : i32
    %c0_i32_1 = arith.constant 0 : i32
    return %c0_i32, %c0_i32_0 : i32, i32
  }
  func.func @transform_2(%arg0: i32) -> (i32, i32) {
    %c0_i32 = arith.constant 0 : i32
    %c0_i32_0 = arith.constant 0 : i32
    %c0_i32_1 = arith.constant 0 : i32
    return %c0_i32, %c0_i32_0 : i32, i32
  }
  func.func @transform_3(%arg0: i32) -> (i32, i32) {
    %c0_i32 = arith.constant 0 : i32
    %c0_i32_0 = arith.constant 0 : i32
    %c0_i32_1 = arith.constant 0 : i32
    return %c0_i32, %c0_i32_0 : i32, i32
  }
  func.func @transform_4(%arg0: i32) -> (i32, i32) {
    %c0_i32 = arith.constant 0 : i32
    %c0_i32_0 = arith.constant 0 : i32
    %c0_i32_1 = arith.constant 0 : i32
    return %c0_i32, %c0_i32_0 : i32, i32
  }
  func.func @transform_5(%arg0: i32) -> (i32, i32) {
    %c0_i32 = arith.constant 0 : i32
    %c0_i32_0 = arith.constant 0 : i32
    return %arg0, %c0_i32 : i32, i32
  }
}

</mosaic_0001>

<bundles_post_ra>
// kernel: tpu_custom_call.1
= control target key start
LH: loop header
LB: loop body
LE: loop exit
PB: predicated region body
PF: predicated region fallthrough
CT: control target
= control target key end

     0   :  { %10 = vsyncpa [#allocation3], 0  ;;  %s424_s0 = inlined_call_operand.hbm [shape: f32[16,32], index: 0, kind: input, shape index: {}]   ;;  %s425_s1 = inlined_call_operand.hbm [shape: bf16[32,32], index: 1, kind: input, shape index: {}]   ;;  %s426_s2 = inlined_call_operand.vmem [shape: f32[1,32], index: 2, kind: input, shape index: {}]   ;;  %s427_s3 = inlined_call_operand.hbm [shape: bf16[32,128], index: 3, kind: input, shape index: {}]   ;;  %s428_s4 = inlined_call_operand.vmem [shape: f32[1,128], index: 4, kind: input, shape index: {}]   ;;  %s429_s5 = inlined_call_operand.vmem [shape: f32[16,4], index: 5, kind: output, shape index: {}]  }
   0x1   :  { %11 = vsyncpa [#allocation5], 0  ;;  %s329_s18 = smov [#allocation4]   ;;  %s259_s22 = scalar_lea.hbm %s425_s1, 256 }
   0x2   :  { %s29_s19 = sshll.u32 %s329_s18, 4  ;;  %p260_p0 = scmp.ne.s32.totalorder %s425_s1, %s259_s22  ;;  %s30_s19 = int_to_ptr.vmem [resolvable:$true] %s29_s19 }
   0x3   :  { %p263_p1 = scmp.lt.u32.totalorder %s259_s22, %s425_s1 }
   0x5   :  { %p265_p2 = pnand %p263_p1, %p260_p0 }
   0x7   :  { %268 = shalt.err (!%p265_p2)
}
   0x8   :  { %s269_s27 = scalar_lea.vmem %s30_s19, 256  ;;  %p274_p4 = scmp.lt.s32.totalorder %s30_s19, %s30_s19 }
   0x9   :  { %p270_p3 = scmp.ne.s32.totalorder %s30_s19, %s269_s27  ;;  %p275_p5 = scmp.lt.s32.totalorder %s269_s27, %s269_s27 }
   0xb   :  { %p276_p6 = por %p275_p5, %p274_p4 }
   0xd   :  { %p277_p7 = pnand %p276_p6, %p270_p3 }
   0xf   :  { %280 = shalt.err (!%p277_p7)
}
  0x10   :  { %s330_s28 = smov 64   ;;  %s331_s29 = smov 4  }
  0x11   :  { %35 = dma.hbm_to_vmem [thread:$0]  %s425_s1, 256, %s30_s19, [#allocation5], %s330_s28, %s330_s28, %s331_s29  }
  0x12   :  { %s332_s7 = smov [#allocation2]   ;;  %s281_s11 = scalar_lea.hbm %s424_s0, 256 }
  0x13   :  { %s17_s8 = sshll.u32 %s332_s7, 4  ;;  %p282_p8 = scmp.ne.s32.totalorder %s424_s0, %s281_s11  ;;  %s18_s8 = int_to_ptr.vmem [resolvable:$true] %s17_s8 }
  0x14   :  { %p285_p9 = scmp.lt.u32.totalorder %s281_s11, %s424_s0 }
  0x16   :  { %p287_p10 = pnand %p285_p9, %p282_p8 }
  0x18   :  { %290 = shalt.err (!%p287_p10)
}
  0x19   :  { %s291_s16 = scalar_lea.vmem %s18_s8, 256  ;;  %p296_p12 = scmp.lt.s32.totalorder %s18_s8, %s18_s8 }
  0x1a   :  { %p292_p11 = scmp.ne.s32.totalorder %s18_s8, %s291_s16  ;;  %p297_p13 = scmp.lt.s32.totalorder %s291_s16, %s291_s16 }
  0x1c   :  { %p298_p0 = por %p297_p13, %p296_p12 }
  0x1e   :  { %p299_p1 = pnand %p298_p0, %p292_p11 }
  0x20   :  { %302 = shalt.err (!%p299_p1)
}
  0x21   :  { %s333_s1 = smov 128   ;;  %s334_s17 = smov 8  }
  0x22   :  { %23 = dma.hbm_to_vmem [thread:$0]  %s424_s0, 256, %s18_s8, [#allocation3], %s333_s1, %s333_s1, %s334_s17  }
  0x23   :  { %s335_s20 = smov [#allocation6]   ;;  %s303_s24 = scalar_lea.hbm %s427_s3, 256 }
  0x24   :  { %s43_s21 = sshll.u32 %s335_s20, 4  ;;  %p304_p2 = scmp.ne.s32.totalorder %s427_s3, %s303_s24  ;;  %s44_s21 = int_to_ptr.vmem [resolvable:$true] %s43_s21 }
  0x25   :  { %p307_p3 = scmp.lt.u32.totalorder %s303_s24, %s427_s3 }
  0x27   :  { %p309_p4 = pnand %p307_p3, %p304_p2 }
  0x29   :  { %312 = shalt.err (!%p309_p4)
}
  0x2a   :  { %s313_s6 = scalar_lea.vmem %s44_s21, 256  ;;  %p318_p6 = scmp.lt.s32.totalorder %s44_s21, %s44_s21 }
  0x2b   :  { %p314_p5 = scmp.ne.s32.totalorder %s44_s21, %s313_s6  ;;  %p319_p7 = scmp.lt.s32.totalorder %s313_s6, %s313_s6 }
  0x2d   :  { %p320_p8 = por %p319_p7, %p318_p6 }
  0x2f   :  { %p321_p9 = pnand %p320_p8, %p314_p5 }
  0x31   :  { %324 = shalt.err (!%p321_p9)
}
  0x32   :  { %49 = dma.hbm_to_vmem [thread:$0]  %s427_s3, 256, %s44_s21, [#allocation5], %s330_s28, %s330_s28, %s331_s29  }
  0x33   :  { %325 = dma.done.wait [#allocation3], 256  }
  0x34   :  { %326 = vsyncadd [#allocation3], 4294967040 }
  0x35   :  { %327 = dma.done.wait [#allocation5], 512  }
  0x36   :  { %328 = vsyncadd [#allocation5], 4294966784  ;;  %v336_v0 = vmov 0.0   ;;  %vm337_vm0 = vmmov 0   ;;  %v251_v1 = vld [vmem:[#allocation4] sm:$0xff]   ;;  %v252_v2 = vld [vmem:[#allocation4 + $0x8] sm:$0xff]  }
  0x37   :  { %226 = vmatprep.subr.bf16.mxu0 %v336_v0  ;;  %230 = vmatprep.mubr.msk.bf16.mxu0 %vm337_vm0, %v336_v0  ;;  %v62_v3 = vld [vmem:[#allocation2] sm:$0xff]  ;;  %v63_v4 = vld [vmem:[#allocation2 + $0x8] sm:$0xff]  ;;  %vm88_vm1 = vcmask 261120   ;;  %vm203_vm2 = vcmask 31744  }
  0x38   :  { %234 = vmatprep.subr.bf16.mxu1 %v336_v0  ;;  %238 = vmatprep.mubr.msk.bf16.mxu1 %vm337_vm0, %v336_v0  ;;  %v64_v5 = vpack.c.bf16 %v63_v4, %v62_v3  ;;  %v253_v6 = vld [vmem:[#allocation6] sm:$0xff]   ;;  %v254_v7 = vld [vmem:[#allocation6 + $0x8] sm:$0xff]  }
  0x39   :  { %227 = vmatpush3.bf16.msra.mxu0 %v251_v1  ;;  %235 = vmatpush3.bf16.msra.mxu1 %v253_v6  ;;  %v212_v8 = vld [vmem:[%s426_s2] ss:$0 sm:$0xff] }
  0x3a   :  { %228 = vmatprep.subr.bf16.mxu0 %v336_v0  ;;  %236 = vmatprep.subr.bf16.mxu1 %v336_v0  ;;  %v216_v18 = vld [vmem:[%s428_s4] ss:$0 sm:$0xff] }
  0x3d   :  { %229 = vmatpush3.bf16.msra.mxu0 %v252_v2  ;;  %237 = vmatpush3.bf16.msra.mxu1 %v254_v7 }
  0x40   :  { %231 = vmatmul.mubr.msk.bf16.vlgmr.msra.gmra.mrb[0].mxu0 %vm88_vm1, %v64_v5 }
 0x113   :  { %v126_v9 = vpop.f32.mrb[0].mxu0 }
 0x114   :  { %v127_v10 = vadd.f32 %v212_v8, %v126_v9  ;;  %v232_v11 = vpop.f32.mrb[1].mxu0 }
 0x115   :  { %v129_v12 = vpop.f32.mrb[2].mxu0 }
 0x116   :  { %v130_v13 = vadd.f32 %v212_v8, %v129_v12  ;;  %v233_v14 = vpop.f32.mrb[3].mxu0  ;;  %255 = vtanh.f32 %v127_v10 }
 0x118   :  { %257 = vtanh.f32 %v130_v13 }
 0x120   :  { %v256_v15 = vpop.eup %255 }
 0x122   :  { %v258_v16 = vpop.eup %257 }
 0x123   :  { %v135_v17 = vpack.c.bf16 %v258_v16, %v256_v15 }
 0x125   :  { %239 = vmatmul.mubr.msk.bf16.vlgmr.msra.gmra.mrb[0].mxu1 %vm88_vm1, %v135_v17 }
 0x1f8   :  { %v196_v19 = vpop.f32.mrb[0].mxu1 }
 0x1f9   :  { %v197_v20 = vadd.f32 %v216_v18, %v196_v19  ;;  %v240_v21 = vpop.f32.mrb[1].mxu1 }
 0x1fa   :  { %v199_v22 = vpop.f32.mrb[2].mxu1 }
 0x1fb   :  { %204 = vst.msk [vmem:[%s429_s5] sm:$0xff] %vm203_vm2, %v197_v20  ;;  %v200_v23 = vadd.f32 %v216_v18, %v199_v22  ;;  %v241_v24 = vpop.f32.mrb[3].mxu1 }
 0x1fd   :  { %205 = vst.msk [vmem:[%s429_s5 + $0x8] sm:$0xff] %vm203_vm2, %v200_v23 }
 0x1fe   :  { %210 = vsyncpa [#allocation3], 1 }
 0x1ff   :  { %211 = vsyncpa [#allocation5], 1 }

// kernel: tpu_custom_call.1
= control target key start
LH: loop header
LB: loop body
LE: loop exit
PB: predicated region body
PF: predicated region fallthrough
CT: control target
= control target key end

     0   :  { %10 = vsyncpa [#allocation3], 0  ;;  %s424_s0 = inlined_call_operand.hbm [shape: f32[16,32], index: 0, kind: input, shape index: {}]   ;;  %s425_s1 = inlined_call_operand.hbm [shape: bf16[32,32], index: 1, kind: input, shape index: {}]   ;;  %s426_s2 = inlined_call_operand.vmem [shape: f32[1,32], index: 2, kind: input, shape index: {}]   ;;  %s427_s3 = inlined_call_operand.hbm [shape: bf16[32,128], index: 3, kind: input, shape index: {}]   ;;  %s428_s4 = inlined_call_operand.vmem [shape: f32[1,128], index: 4, kind: input, shape index: {}]   ;;  %s429_s5 = inlined_call_operand.vmem [shape: f32[16,4], index: 5, kind: output, shape index: {}]  }
   0x1   :  { %11 = vsyncpa [#allocation5], 0  ;;  %s329_s18 = smov [#allocation4]   ;;  %s259_s22 = scalar_lea.hbm %s425_s1, 256 }
   0x2   :  { %s29_s19 = sshll.u32 %s329_s18, 4  ;;  %p260_p0 = scmp.ne.s32.totalorder %s425_s1, %s259_s22  ;;  %s30_s19 = int_to_ptr.vmem [resolvable:$true] %s29_s19 }
   0x3   :  { %p263_p1 = scmp.lt.u32.totalorder %s259_s22, %s425_s1 }
   0x5   :  { %p265_p2 = pnand %p263_p1, %p260_p0 }
   0x7   :  { %268 = shalt.err (!%p265_p2)
}
   0x8   :  { %s269_s27 = scalar_lea.vmem %s30_s19, 256  ;;  %p274_p4 = scmp.lt.s32.totalorder %s30_s19, %s30_s19 }
   0x9   :  { %p270_p3 = scmp.ne.s32.totalorder %s30_s19, %s269_s27  ;;  %p275_p5 = scmp.lt.s32.totalorder %s269_s27, %s269_s27 }
   0xb   :  { %p276_p6 = por %p275_p5, %p274_p4 }
   0xd   :  { %p277_p7 = pnand %p276_p6, %p270_p3 }
   0xf   :  { %280 = shalt.err (!%p277_p7)
}
  0x10   :  { %s330_s28 = smov 64   ;;  %s331_s29 = smov 4  }
  0x11   :  { %35 = dma.hbm_to_vmem [thread:$0]  %s425_s1, 256, %s30_s19, [#allocation5], %s330_s28, %s330_s28, %s331_s29  }
  0x12   :  { %s332_s7 = smov [#allocation2]   ;;  %s281_s11 = scalar_lea.hbm %s424_s0, 256 }
  0x13   :  { %s17_s8 = sshll.u32 %s332_s7, 4  ;;  %p282_p8 = scmp.ne.s32.totalorder %s424_s0, %s281_s11  ;;  %s18_s8 = int_to_ptr.vmem [resolvable:$true] %s17_s8 }
  0x14   :  { %p285_p9 = scmp.lt.u32.totalorder %s281_s11, %s424_s0 }
  0x16   :  { %p287_p10 = pnand %p285_p9, %p282_p8 }
  0x18   :  { %290 = shalt.err (!%p287_p10)
}
  0x19   :  { %s291_s16 = scalar_lea.vmem %s18_s8, 256  ;;  %p296_p12 = scmp.lt.s32.totalorder %s18_s8, %s18_s8 }
  0x1a   :  { %p292_p11 = scmp.ne.s32.totalorder %s18_s8, %s291_s16  ;;  %p297_p13 = scmp.lt.s32.totalorder %s291_s16, %s291_s16 }
  0x1c   :  { %p298_p0 = por %p297_p13, %p296_p12 }
  0x1e   :  { %p299_p1 = pnand %p298_p0, %p292_p11 }
  0x20   :  { %302 = shalt.err (!%p299_p1)
}
  0x21   :  { %s333_s1 = smov 128   ;;  %s334_s17 = smov 8  }
  0x22   :  { %23 = dma.hbm_to_vmem [thread:$0]  %s424_s0, 256, %s18_s8, [#allocation3], %s333_s1, %s333_s1, %s334_s17  }
  0x23   :  { %s335_s20 = smov [#allocation6]   ;;  %s303_s24 = scalar_lea.hbm %s427_s3, 256 }
  0x24   :  { %s43_s21 = sshll.u32 %s335_s20, 4  ;;  %p304_p2 = scmp.ne.s32.totalorder %s427_s3, %s303_s24  ;;  %s44_s21 = int_to_ptr.vmem [resolvable:$true] %s43_s21 }
  0x25   :  { %p307_p3 = scmp.lt.u32.totalorder %s303_s24, %s427_s3 }
  0x27   :  { %p309_p4 = pnand %p307_p3, %p304_p2 }
  0x29   :  { %312 = shalt.err (!%p309_p4)
}
  0x2a   :  { %s313_s6 = scalar_lea.vmem %s44_s21, 256  ;;  %p318_p6 = scmp.lt.s32.totalorder %s44_s21, %s44_s21 }
  0x2b   :  { %p314_p5 = scmp.ne.s32.totalorder %s44_s21, %s313_s6  ;;  %p319_p7 = scmp.lt.s32.totalorder %s313_s6, %s313_s6 }
  0x2d   :  { %p320_p8 = por %p319_p7, %p318_p6 }
  0x2f   :  { %p321_p9 = pnand %p320_p8, %p314_p5 }
  0x31   :  { %324 = shalt.err (!%p321_p9)
}
  0x32   :  { %49 = dma.hbm_to_vmem [thread:$0]  %s427_s3, 256, %s44_s21, [#allocation5], %s330_s28, %s330_s28, %s331_s29  }
  0x33   :  { %325 = dma.done.wait [#allocation3], 256  }
  0x34   :  { %326 = vsyncadd [#allocation3], 4294967040 }
  0x35   :  { %327 = dma.done.wait [#allocation5], 512  }
  0x36   :  { %328 = vsyncadd [#allocation5], 4294966784  ;;  %v336_v0 = vmov 0.0   ;;  %vm337_vm0 = vmmov 0   ;;  %v251_v1 = vld [vmem:[#allocation4] sm:$0xff]   ;;  %v252_v2 = vld [vmem:[#allocation4 + $0x8] sm:$0xff]  }
  0x37   :  { %226 = vmatprep.subr.bf16.mxu0 %v336_v0  ;;  %230 = vmatprep.mubr.msk.bf16.mxu0 %vm337_vm0, %v336_v0  ;;  %v62_v3 = vld [vmem:[#allocation2] sm:$0xff]  ;;  %v63_v4 = vld [vmem:[#allocation2 + $0x8] sm:$0xff]  ;;  %vm88_vm1 = vcmask 261120   ;;  %vm203_vm2 = vcmask 31744  }
  0x38   :  { %234 = vmatprep.subr.bf16.mxu1 %v336_v0  ;;  %238 = vmatprep.mubr.msk.bf16.mxu1 %vm337_vm0, %v336_v0  ;;  %v64_v5 = vpack.c.bf16 %v63_v4, %v62_v3  ;;  %v253_v6 = vld [vmem:[#allocation6] sm:$0xff]   ;;  %v254_v7 = vld [vmem:[#allocation6 + $0x8] sm:$0xff]  }
  0x39   :  { %227 = vmatpush3.bf16.msra.mxu0 %v251_v1  ;;  %235 = vmatpush3.bf16.msra.mxu1 %v253_v6  ;;  %v212_v8 = vld [vmem:[%s426_s2] ss:$0 sm:$0xff] }
  0x3a   :  { %228 = vmatprep.subr.bf16.mxu0 %v336_v0  ;;  %236 = vmatprep.subr.bf16.mxu1 %v336_v0  ;;  %v216_v18 = vld [vmem:[%s428_s4] ss:$0 sm:$0xff] }
  0x3d   :  { %229 = vmatpush3.bf16.msra.mxu0 %v252_v2  ;;  %237 = vmatpush3.bf16.msra.mxu1 %v254_v7 }
  0x40   :  { %231 = vmatmul.mubr.msk.bf16.vlgmr.msra.gmra.mrb[0].mxu0 %vm88_vm1, %v64_v5 }
 0x113   :  { %v126_v9 = vpop.f32.mrb[0].mxu0 }
 0x114   :  { %v127_v10 = vadd.f32 %v212_v8, %v126_v9  ;;  %v232_v11 = vpop.f32.mrb[1].mxu0 }
 0x115   :  { %v129_v12 = vpop.f32.mrb[2].mxu0 }
 0x116   :  { %v130_v13 = vadd.f32 %v212_v8, %v129_v12  ;;  %v233_v14 = vpop.f32.mrb[3].mxu0  ;;  %255 = vtanh.f32 %v127_v10 }
 0x118   :  { %257 = vtanh.f32 %v130_v13 }
 0x120   :  { %v256_v15 = vpop.eup %255 }
 0x122   :  { %v258_v16 = vpop.eup %257 }
 0x123   :  { %v135_v17 = vpack.c.bf16 %v258_v16, %v256_v15 }
 0x125   :  { %239 = vmatmul.mubr.msk.bf16.vlgmr.msra.gmra.mrb[0].mxu1 %vm88_vm1, %v135_v17 }
 0x1f8   :  { %v196_v19 = vpop.f32.mrb[0].mxu1 }
 0x1f9   :  { %v197_v20 = vadd.f32 %v216_v18, %v196_v19  ;;  %v240_v21 = vpop.f32.mrb[1].mxu1 }
 0x1fa   :  { %v199_v22 = vpop.f32.mrb[2].mxu1 }
 0x1fb   :  { %204 = vst.msk [vmem:[%s429_s5] sm:$0xff] %vm203_vm2, %v197_v20  ;;  %v200_v23 = vadd.f32 %v216_v18, %v199_v22  ;;  %v241_v24 = vpop.f32.mrb[3].mxu1 }
 0x1fd   :  { %205 = vst.msk [vmem:[%s429_s5 + $0x8] sm:$0xff] %vm203_vm2, %v200_v23 }
 0x1fe   :  { %210 = vsyncpa [#allocation3], 1 }
 0x1ff   :  { %211 = vsyncpa [#allocation5], 1 }

</bundles_post_ra>
